<compile_context>
chip_gen: v6e
topology: v6e:2x2x1
jax: 0.10.0
libtpu: 0.0.40
codegen_flags: <defaults>
</compile_context>

<pallas_src>
import jax
import jax.numpy as jnp
import numpy as np
from jax.experimental import pallas as pl
from jax.experimental.pallas import tpu as pltpu


def _value_mlp_kernel(x_ref, w1_ref, b1_ref, w2_ref, b2_ref, w3_ref, b3_ref, o_ref):
    # x_ref:  [TB, F]    f32 (streamed batch tile)
    # w1_ref: [F, 128]   f32 (resident)      b1_ref: [1, 128] f32 (resident)
    # w2_ref: [128, 64]  f32 (resident)      b2_ref: [1, 64]  f32 (resident)
    # w3_ref: [1, 64]    f32 (resident row)  b3_ref: [1]      f32 (SMEM scalar)
    # o_ref:  [1, 1, TB] f32 (lane-dense: batch along lanes)
    x = x_ref[...]
    h1 = jnp.dot(x, w1_ref[...], preferred_element_type=jnp.float32)         # MXU -> [TB, 128]
    h1 = jnp.maximum(h1 + b1_ref[...], 0.0)                                   # VPU
    h2 = jnp.dot(h1, w2_ref[...], preferred_element_type=jnp.float32)         # MXU -> [TB, 64]
    h2 = jnp.maximum(h2 + b2_ref[...], 0.0)                                   # VPU
    # Final Linear(64, 1): VPU multiply + XLU lane-reduce (keeps the MXU free and
    # avoids an N=1 matmul with masked output lanes).
    out = jnp.sum(h2 * w3_ref[...], axis=-1) + b3_ref[0]                      # [TB]
    o_ref[...] = out.reshape(1, 1, -1)


def _round_up(x, m):
    return ((x + m - 1) // m) * m


def _pick_tb(batch):
    """Static (trace-time) batch-tile selection.

    - Small/ragged RL batches: one tile of round_up(B, 128); the partial x tile is
      handled by Pallas (no jnp.pad HBM copy).
    - Large batches: >= 2 tiles so the "parallel" batch axis can shard across v7x's
      2 TensorCores; capped at 2048 rows (~2.5 MiB f32 per-tile VMEM, well under the
      scoped-VMEM defaults of v5e/v6e/v7x).
    """
    if batch <= 2048:
        return max(128, _round_up(batch, 128))
    return min(2048, _round_up(pl.cdiv(batch, 2), 128))


@jax.jit
def value_network_forward(x, params):
    """x: [B, feature_dim] float32; params: dict with
    w1[F,128], b1[128], w2[128,64], b2[64], w3[64,1], b3[1].  Returns [B, 1] f32."""
    B, F = x.shape
    tb = _pick_tb(B)                       # Python int at trace time (static shapes)
    num_tiles = pl.cdiv(B, tb)

    x = x.astype(jnp.float32)
    w1 = params["w1"].astype(jnp.float32)
    w2 = params["w2"].astype(jnp.float32)
    b1 = params["b1"].reshape(1, -1).astype(jnp.float32)
    b2 = params["b2"].reshape(1, -1).astype(jnp.float32)
    w3 = params["w3"].reshape(1, -1).astype(jnp.float32)      # [1, 64] row
    b3 = params["b3"].reshape(-1).astype(jnp.float32)         # [1] scalar via SMEM

    # Constant index_map => block stays resident in VMEM across grid steps.
    def resident(a):
        return pl.BlockSpec(a.shape, lambda i: (0,) * a.ndim)

    out_rows = pl.pallas_call(
        _value_mlp_kernel,
        out_shape=jax.ShapeDtypeStruct((num_tiles, 1, tb), jnp.float32),
        grid=(num_tiles,),
        in_specs=[
            pl.BlockSpec((tb, F), lambda i: (i, 0)),                    # streamed x tile
            resident(w1), resident(b1),
            resident(w2), resident(b2),
            resident(w3),
            pl.BlockSpec(memory_space=pltpu.MemorySpace.SMEM),          # b3 scalar
        ],
        out_specs=pl.BlockSpec((1, 1, tb), lambda i: (i, 0, 0)),        # lane-dense row
        compiler_params=pltpu.CompilerParams(
            dimension_semantics=("parallel",),       # shards batch tiles across TCs on v7x
            vmem_limit_bytes=32 * 1024 * 1024,       # covers v5e's 16 MiB scoped default
        ),
    )(x, w1, b1, w2, b2, w3, b3)

    # (num_tiles, 1, TB) row-major flatten == batch order; drop tail rows past B
    # (those rows came from the partial last x tile and hold unspecified values).
    return out_rows.reshape(-1)[:B].reshape(B, 1)


def init_params(feature_dim, key):
    """Deterministic init mimicking PyTorch's default Linear init
    (uniform(-1/sqrt(fan_in), 1/sqrt(fan_in))). Weights stored as [in, out]."""
    ks = jax.random.split(key, 6)

    def linear(kw, kb, fan_in, fan_out):
        bound = 1.0 / np.sqrt(fan_in)
        w = jax.random.uniform(kw, (fan_in, fan_out), jnp.float32, -bound, bound)
        b = jax.random.uniform(kb, (fan_out,), jnp.float32, -bound, bound)
        return w, b

    w1, b1 = linear(ks[0], ks[1], feature_dim, 128)
    w2, b2 = linear(ks[2], ks[3], 128, 64)
    w3, b3 = linear(ks[4], ks[5], 64, 1)
    return {"w1": w1, "b1": b1, "w2": w2, "b2": b2, "w3": w3, "b3": b3}


def _reference(x, params):
    """Pure-JAX f32 forward (matches the PyTorch module)."""
    h1 = jnp.maximum(x @ params["w1"] + params["b1"], 0.0)
    h2 = jnp.maximum(h1 @ params["w2"] + params["b2"], 0.0)
    return h2 @ params["w3"] + params["b3"]


if __name__ == "__main__":
    key = jax.random.PRNGKey(0)
    k_param, k_x1, k_x2 = jax.random.split(key, 3)

    feature_dim = 32
    params = init_params(feature_dim, k_param)

    # batch=8  -> single partial tile (no pad copy);
    # batch=300 -> still single 384-row tile, exercises the tail-row slice path.
    for batch, kx in ((8, k_x1), (300, k_x2)):
        x = jax.random.normal(kx, (batch, feature_dim), jnp.float32)

        out = jax.block_until_ready(value_network_forward(x, params))
        assert out.shape == (batch, 1), out.shape

        ref = _reference(x, params)
        np.testing.assert_allclose(np.asarray(out), np.asarray(ref),
                                   rtol=1e-5, atol=1e-5)

    print("KERNEL_OK")
</pallas_src>

<mosaic_0001>
module attributes {stable_mosaic.version = 11 : i64} {
  func.func @_value_mlp_kernel(%arg0: i32, %arg1: memref<128x32xf32, #tpu.memory_space<vmem>>, %arg2: memref<32x128xf32, #tpu.memory_space<vmem>>, %arg3: memref<1x128xf32, #tpu.memory_space<vmem>>, %arg4: memref<128x64xf32, #tpu.memory_space<vmem>>, %arg5: memref<1x64xf32, #tpu.memory_space<vmem>>, %arg6: memref<1x64xf32, #tpu.memory_space<vmem>>, %arg7: memref<1xf32, #tpu.memory_space<smem>>, %arg8: memref<1x1x128xf32, #tpu.memory_space<vmem>>) attributes {dimension_semantics = [#tpu.dimension_semantics<parallel>], iteration_bounds = array<i64: 1>, scalar_prefetch = 0 : i64, scratch_operands = 0 : i64, tpu.core_type = #tpu.core_type<tc>, window_params = [{transform_indices = @transform_0, window_bounds = array<i64: 128, 32>}, {pipeline_mode = #tpu.pipeline_mode<synchronous>, transform_indices = @transform_1, window_bounds = array<i64: 32, 128>}, {pipeline_mode = #tpu.pipeline_mode<synchronous>, transform_indices = @transform_2, window_bounds = array<i64: 1, 128>}, {pipeline_mode = #tpu.pipeline_mode<synchronous>, transform_indices = @transform_3, window_bounds = array<i64: 128, 64>}, {pipeline_mode = #tpu.pipeline_mode<synchronous>, transform_indices = @transform_4, window_bounds = array<i64: 1, 64>}, {pipeline_mode = #tpu.pipeline_mode<synchronous>, transform_indices = @transform_5, window_bounds = array<i64: 1, 64>}, {transform_indices = @transform_6, window_bounds = array<i64: 1>}, {transform_indices = @transform_7, window_bounds = array<i64: 1, 1, 128>}]} {
    %c0 = arith.constant 0 : index
    %c0_0 = arith.constant 0 : index
    %0 = vector.load %arg1[%c0, %c0_0] : memref<128x32xf32, #tpu.memory_space<vmem>>, vector<128x32xf32>
    %c0_1 = arith.constant 0 : index
    %c0_2 = arith.constant 0 : index
    %1 = vector.load %arg2[%c0_1, %c0_2] : memref<32x128xf32, #tpu.memory_space<vmem>>, vector<32x128xf32>
    %cst = arith.constant dense<0.000000e+00> : vector<128x128xf32>
    %2 = tpu.matmul %0, %1, %cst {dimension_numbers = #tpu.dot_dimension_numbers<[1], [0], [0], [1], [0, 0, 1, 1], [], []>} : vector<128x32xf32>, vector<32x128xf32>, vector<128x128xf32> -> vector<128x128xf32>
    %c0_3 = arith.constant 0 : index
    %c0_4 = arith.constant 0 : index
    %3 = vector.load %arg3[%c0_3, %c0_4] : memref<1x128xf32, #tpu.memory_space<vmem>>, vector<1x128xf32>
    %4 = vector.broadcast %3 : vector<1x128xf32> to vector<128x128xf32>
    %5 = arith.addf %2, %4 : vector<128x128xf32>
    %cst_5 = arith.constant 0.000000e+00 : f32
    %6 = vector.broadcast %cst_5 : f32 to vector<128x128xf32>
    %7 = arith.maximumf %5, %6 : vector<128x128xf32>
    %c0_6 = arith.constant 0 : index
    %c0_7 = arith.constant 0 : index
    %8 = vector.load %arg4[%c0_6, %c0_7] : memref<128x64xf32, #tpu.memory_space<vmem>>, vector<128x64xf32>
    %cst_8 = arith.constant dense<0.000000e+00> : vector<128x64xf32>
    %9 = tpu.matmul %7, %8, %cst_8 {dimension_numbers = #tpu.dot_dimension_numbers<[1], [0], [0], [1], [0, 0, 1, 1], [], []>} : vector<128x128xf32>, vector<128x64xf32>, vector<128x64xf32> -> vector<128x64xf32>
    %c0_9 = arith.constant 0 : index
    %c0_10 = arith.constant 0 : index
    %10 = vector.load %arg5[%c0_9, %c0_10] : memref<1x64xf32, #tpu.memory_space<vmem>>, vector<1x64xf32>
    %11 = vector.broadcast %10 : vector<1x64xf32> to vector<128x64xf32>
    %12 = arith.addf %9, %11 : vector<128x64xf32>
    %cst_11 = arith.constant 0.000000e+00 : f32
    %13 = vector.broadcast %cst_11 : f32 to vector<128x64xf32>
    %14 = arith.maximumf %12, %13 : vector<128x64xf32>
    %c0_12 = arith.constant 0 : index
    %c0_13 = arith.constant 0 : index
    %15 = vector.load %arg6[%c0_12, %c0_13] : memref<1x64xf32, #tpu.memory_space<vmem>>, vector<1x64xf32>
    %16 = vector.broadcast %15 : vector<1x64xf32> to vector<128x64xf32>
    %17 = arith.mulf %14, %16 : vector<128x64xf32>
    %cst_14 = arith.constant dense<0.000000e+00> : vector<128xf32>
    %18 = vector.multi_reduction <add>, %17, %cst_14 [1] : vector<128x64xf32> to vector<128xf32>
    %c0_15 = arith.constant 0 : index
    %19 = memref.load %arg7[%c0_15] : memref<1xf32, #tpu.memory_space<smem>>
    %20 = vector.broadcast %19 : f32 to vector<128xf32>
    %21 = arith.addf %18, %20 : vector<128xf32>
    %22 = vector.shape_cast %21 : vector<128xf32> to vector<1x1x128xf32>
    %c0_16 = arith.constant 0 : index
    %c0_17 = arith.constant 0 : index
    %c0_18 = arith.constant 0 : index
    %23 = vector.load %arg8[%c0_16, %c0_17, %c0_18] : memref<1x1x128xf32, #tpu.memory_space<vmem>>, vector<1x1x128xf32>
    tpu.vector_store %arg8[%c0_16, %c0_17, %c0_18], %22 {strides = array<i32>} : memref<1x1x128xf32, #tpu.memory_space<vmem>>, vector<1x1x128xf32>,
    return
  }
  func.func @transform_0(%arg0: i32) -> (i32, i32) {
    %c0_i32 = arith.constant 0 : i32
    %c0_i32_0 = arith.constant 0 : i32
    return %arg0, %c0_i32 : i32, i32
  }
  func.func @transform_1(%arg0: i32) -> (i32, i32) {
    %c0_i32 = arith.constant 0 : i32
    %c0_i32_0 = arith.constant 0 : i32
    %c0_i32_1 = arith.constant 0 : i32
    return %c0_i32, %c0_i32_0 : i32, i32
  }
  func.func @transform_2(%arg0: i32) -> (i32, i32) {
    %c0_i32 = arith.constant 0 : i32
    %c0_i32_0 = arith.constant 0 : i32
    %c0_i32_1 = arith.constant 0 : i32
    return %c0_i32, %c0_i32_0 : i32, i32
  }
  func.func @transform_3(%arg0: i32) -> (i32, i32) {
    %c0_i32 = arith.constant 0 : i32
    %c0_i32_0 = arith.constant 0 : i32
    %c0_i32_1 = arith.constant 0 : i32
    return %c0_i32, %c0_i32_0 : i32, i32
  }
  func.func @transform_4(%arg0: i32) -> (i32, i32) {
    %c0_i32 = arith.constant 0 : i32
    %c0_i32_0 = arith.constant 0 : i32
    %c0_i32_1 = arith.constant 0 : i32
    return %c0_i32, %c0_i32_0 : i32, i32
  }
  func.func @transform_5(%arg0: i32) -> (i32, i32) {
    %c0_i32 = arith.constant 0 : i32
    %c0_i32_0 = arith.constant 0 : i32
    %c0_i32_1 = arith.constant 0 : i32
    return %c0_i32, %c0_i32_0 : i32, i32
  }
  func.func @transform_6(%arg0: i32) -> i32 {
    %c0_i32 = arith.constant 0 : i32
    %c0_i32_0 = arith.constant 0 : i32
    return %c0_i32 : i32
  }
  func.func @transform_7(%arg0: i32) -> (i32, i32, i32) {
    %c0_i32 = arith.constant 0 : i32
    %c0_i32_0 = arith.constant 0 : i32
    %c0_i32_1 = arith.constant 0 : i32
    return %arg0, %c0_i32, %c0_i32_0 : i32, i32, i32
  }
}

</mosaic_0001>

<bundles_post_ra>
// kernel: value_network_forward.1
= control target key start
LH: loop header
LB: loop body
LE: loop exit
PB: predicated region body
PF: predicated region fallthrough
CT: control target
= control target key end

     0   :  { %vm54_vm0 = vcmask 261120   ;;  %vm471_vm1 = vcmask 523264   ;;  %vm565_vm2 = vcmask 130112   ;;  %vm572_vm3 = vcmask 195712   ;;  %s1147_s1 = inlined_call_operand.vmem [shape: f32[32,128], index: 1, kind: input, shape index: {}]   ;;  %s1148_s0 = inlined_call_operand.vmem [shape: f32[8,32], index: 0, kind: input, shape index: {}]   ;;  %s1149_s3 = inlined_call_operand.vmem [shape: f32[128,64], index: 3, kind: input, shape index: {}]   ;;  %s1150_s2 = inlined_call_operand.vmem [shape: f32[1,128], index: 2, kind: input, shape index: {}]   ;;  %s1151_s4 = inlined_call_operand.vmem [shape: f32[1,64], index: 4, kind: input, shape index: {}]   ;;  %s1152_s5 = inlined_call_operand.vmem [shape: f32[1,64], index: 5, kind: input, shape index: {}]   ;;  %s1153_s6 = inlined_call_operand.<no memory space> [shape: f32[1], index: 6, kind: input, shape index: {}]   ;;  %s1154_s7 = inlined_call_operand.vmem [shape: f32[1,1,128], index: 7, kind: output, shape index: {}]  }
   0x1   :  { %v46_v0 = vld [vmem:[%s1147_s1 + $0x18] sm:$0xff]  ;;  %v45_v1 = vld [vmem:[%s1147_s1 + $0x10] sm:$0xff]  ;;  %v27_v2 = vld [vmem:[%s1148_s0] sm:$0xff]  ;;  %vm579_vm4 = vcmask 261312   ;;  %vm586_vm5 = vcmask 326912   ;;  %vm593_vm6 = vcmask 392512  }
   0x2   :  { %742 = vmatprep.subr.mxu0 %v46_v0  ;;  %v44_v3 = vld [vmem:[%s1147_s1 + $0x8] sm:$0xff]  ;;  %750 = vmatprep.mubr.msk.f32.mxu0 %vm54_vm0, %v27_v2  ;;  %v43_v4 = vld [vmem:[%s1147_s1] sm:$0xff]  ;;  %v279_v6 = vld [vmem:[%s1149_s3 + $0x78] sm:$0xff]  ;;  %vm600_vm7 = vcmask 458112   ;;  %vm607_vm8 = vcmask 523712   ;;  %vm614_vm9 = vcmask 589312  }
   0x3   :  { %743 = vmatpush3.msra.mxu0 %v46_v0  ;;  %v28_v5 = vld [vmem:[%s1148_s0 + $0x8] sm:$0xff]  ;;  %v29_v7 = vld [vmem:[%s1148_s0 + $0x10] sm:$0xff]  ;;  %830 = vmatprep.subr.mxu1 %v279_v6  ;;  %v30_v9 = vld [vmem:[%s1148_s0 + $0x18] sm:$0xff]  ;;  %vm621_vm10 = vcmask 654912   ;;  %vm628_vm11 = vcmask 720512   ;;  %vm635_vm12 = vcmask 786112  }
   0x4   :  { %744 = vmatprep.subr.mxu0 %v45_v1  ;;  %v278_v8 = vld [vmem:[%s1149_s3 + $0x70] sm:$0xff]  ;;  %846 = vmatpush3.msra.mxu1 %v279_v6  ;;  %v277_v10 = vld [vmem:[%s1149_s3 + $0x68] sm:$0xff]  ;;  %v31_v11 = vld [vmem:[%s1148_s0 + $0x20] sm:$0xff]  ;;  %vm642_vm13 = vcmask 851712   ;;  %vm649_vm14 = vcmask 917312   ;;  %vm656_vm15 = vcmask 982912  }
   0x5   :  { %745 = vmatpush3.msra.mxu0 %v45_v1  ;;  %831 = vmatprep.subr.mxu1 %v278_v8  ;;  %v276_v12 = vld [vmem:[%s1149_s3 + $0x60] sm:$0xff]  ;;  %v32_v13 = vld [vmem:[%s1148_s0 + $0x28] sm:$0xff]  ;;  %v275_v14 = vld [vmem:[%s1149_s3 + $0x58] sm:$0xff] }
   0x6   :  { %746 = vmatprep.subr.mxu0 %v44_v3  ;;  %847 = vmatpush3.msra.mxu1 %v278_v8  ;;  %v33_v15 = vld [vmem:[%s1148_s0 + $0x30] sm:$0xff]  ;;  %v34_v17 = vld [vmem:[%s1148_s0 + $0x38] sm:$0xff]  ;;  %v273_v18 = vld [vmem:[%s1149_s3 + $0x48] sm:$0xff] }
   0x7   :  { %747 = vmatpush3.msra.mxu0 %v44_v3  ;;  %832 = vmatprep.subr.mxu1 %v277_v10  ;;  %v274_v16 = vld [vmem:[%s1149_s3 + $0x50] sm:$0xff]  ;;  %v35_v19 = vld [vmem:[%s1148_s0 + $0x40] sm:$0xff]  ;;  %v36_v21 = vld [vmem:[%s1148_s0 + $0x48] sm:$0xff] }
   0x8   :  { %748 = vmatprep.subr.mxu0 %v43_v4  ;;  %848 = vmatpush3.msra.mxu1 %v277_v10  ;;  %v272_v20 = vld [vmem:[%s1149_s3 + $0x40] sm:$0xff]  ;;  %v271_v22 = vld [vmem:[%s1149_s3 + $0x38] sm:$0xff]  ;;  %v37_v23 = vld [vmem:[%s1148_s0 + $0x50] sm:$0xff] }
   0x9   :  { %749 = vmatpush3.msra.mxu0 %v43_v4  ;;  %833 = vmatprep.subr.mxu1 %v276_v12  ;;  %v270_v24 = vld [vmem:[%s1149_s3 + $0x30] sm:$0xff]  ;;  %v38_v25 = vld [vmem:[%s1148_s0 + $0x58] sm:$0xff]  ;;  %v269_v26 = vld [vmem:[%s1149_s3 + $0x28] sm:$0xff] }
   0xa   :  { %751 = vmatmul.mubr.msk.f32.vlgmr.msra.gmra.mxu0 %vm54_vm0, %v28_v5  ;;  %774 = vmatprep.subr.mxu0 %v279_v6  ;;  %v39_v27 = vld [vmem:[%s1148_s0 + $0x60] sm:$0xff]  ;;  %v40_v29 = vld [vmem:[%s1148_s0 + $0x68] sm:$0xff]  ;;  %v267_v30 = vld [vmem:[%s1149_s3 + $0x18] sm:$0xff] }
   0xb   :  { %753 = vmatprep.mubr.msk.f32.mxu0 %vm54_vm0, %v29_v7  ;;  %775 = vmatpush3.msra.mxu0 %v279_v6  ;;  %v268_v28 = vld [vmem:[%s1149_s3 + $0x20] sm:$0xff]  ;;  %v41_v31 = vld [vmem:[%s1148_s0 + $0x70] sm:$0xff]  ;;  %v42_v32 = vld [vmem:[%s1148_s0 + $0x78] sm:$0xff] }
   0xc   :  { %776 = vmatprep.subr.mxu0 %v278_v8  ;;  %849 = vmatpush3.msra.mxu1 %v276_v12  ;;  %v266_v33 = vld [vmem:[%s1149_s3 + $0x10] sm:$0xff]  ;;  %v265_v34 = vld [vmem:[%s1149_s3 + $0x8] sm:$0xff]  ;;  %v264_v35 = vld [vmem:[%s1149_s3] sm:$0xff] }
   0xd   :  { %777 = vmatpush3.msra.mxu0 %v278_v8  ;;  %834 = vmatprep.subr.mxu1 %v275_v14  ;;  %v671_v36 = vld [vmem:[%s1150_s2] ss:$0 sm:$0xff] }
   0xe   :  { %754 = vmatmul.mubr.msk.f32.gmra.mxu0 %vm54_vm0, %v30_v9  ;;  %778 = vmatprep.subr.mxu0 %v277_v10 }
   0xf   :  { %756 = vmatprep.mubr.msk.f32.mxu0 %vm54_vm0, %v31_v11  ;;  %779 = vmatpush3.msra.mxu0 %v277_v10 }
  0x10   :  { %780 = vmatprep.subr.mxu0 %v276_v12  ;;  %850 = vmatpush3.msra.mxu1 %v275_v14 }
  0x11   :  { %781 = vmatpush3.msra.mxu0 %v276_v12  ;;  %835 = vmatprep.subr.mxu1 %v274_v16 }
  0x12   :  { %757 = vmatmul.mubr.msk.f32.gmra.mxu0 %vm54_vm0, %v32_v13  ;;  %782 = vmatprep.subr.mxu0 %v275_v14 }
  0x13   :  { %759 = vmatprep.mubr.msk.f32.mxu0 %vm54_vm0, %v33_v15  ;;  %783 = vmatpush3.msra.mxu0 %v275_v14 }
  0x14   :  { %784 = vmatprep.subr.mxu0 %v274_v16  ;;  %851 = vmatpush3.msra.mxu1 %v274_v16 }
  0x15   :  { %785 = vmatpush3.msra.mxu0 %v274_v16  ;;  %836 = vmatprep.subr.mxu1 %v273_v18 }
  0x16   :  { %760 = vmatmul.mubr.msk.f32.gmra.mxu0 %vm54_vm0, %v34_v17  ;;  %786 = vmatprep.subr.mxu0 %v273_v18 }
  0x17   :  { %762 = vmatprep.mubr.msk.f32.mxu0 %vm54_vm0, %v35_v19  ;;  %787 = vmatpush3.msra.mxu0 %v273_v18 }
  0x18   :  { %788 = vmatprep.subr.mxu0 %v272_v20  ;;  %852 = vmatpush3.msra.mxu1 %v273_v18 }
  0x19   :  { %789 = vmatpush3.msra.mxu0 %v272_v20  ;;  %837 = vmatprep.subr.mxu1 %v272_v20 }
  0x1a   :  { %763 = vmatmul.mubr.msk.f32.gmra.mxu0 %vm54_vm0, %v36_v21  ;;  %790 = vmatprep.subr.mxu0 %v271_v22  ;;  %v1032_v21 = vld [vmem:[%s1151_s4] ss:$0 sm:$0xff] }
  0x1b   :  { %765 = vmatprep.mubr.msk.f32.mxu0 %vm54_vm0, %v37_v23  ;;  %791 = vmatpush3.msra.mxu0 %v271_v22 }
  0x1c   :  { %792 = vmatprep.subr.mxu0 %v270_v24  ;;  %853 = vmatpush3.msra.mxu1 %v272_v20 }
  0x1d   :  { %793 = vmatpush3.msra.mxu0 %v270_v24  ;;  %838 = vmatprep.subr.mxu1 %v271_v22 }
  0x1e   :  { %766 = vmatmul.mubr.msk.f32.gmra.mxu0 %vm54_vm0, %v38_v25  ;;  %794 = vmatprep.subr.mxu0 %v269_v26  ;;  %v1038_v25 = vld [vmem:[%s1152_s5] ss:$0 sm:$0xff] }
  0x1f   :  { %768 = vmatprep.mubr.msk.f32.mxu0 %vm54_vm0, %v39_v27  ;;  %795 = vmatpush3.msra.mxu0 %v269_v26 }
  0x20   :  { %796 = vmatprep.subr.mxu0 %v268_v28  ;;  %854 = vmatpush3.msra.mxu1 %v271_v22 }
  0x21   :  { %797 = vmatpush3.msra.mxu0 %v268_v28  ;;  %839 = vmatprep.subr.mxu1 %v270_v24 }
  0x22   :  { %769 = vmatmul.mubr.msk.f32.gmra.mxu0 %vm54_vm0, %v40_v29  ;;  %798 = vmatprep.subr.mxu0 %v267_v30 }
  0x23   :  { %771 = vmatprep.mubr.msk.f32.mxu0 %vm54_vm0, %v41_v31  ;;  %799 = vmatpush3.msra.mxu0 %v267_v30 }
  0x24   :  { %855 = vmatpush3.msra.mxu1 %v270_v24  ;;  %800 = vmatprep.subr.mxu0 %v266_v33 }
  0x25   :  { %840 = vmatprep.subr.mxu1 %v269_v26  ;;  %801 = vmatpush3.msra.mxu0 %v266_v33 }
  0x26   :  { %772 = vmatmul.mubr.msk.f32.gmra.mxu0 %vm54_vm0, %v42_v32  ;;  %856 = vmatpush3.msra.mxu1 %v269_v26  ;;  %vm663_vm0 = vcmask 1048512  }
  0x27   :  { %841 = vmatprep.subr.mxu1 %v268_v28  ;;  %802 = vmatprep.subr.mxu0 %v265_v34 }
  0x28   :  { %857 = vmatpush3.msra.mxu1 %v268_v28  ;;  %803 = vmatpush3.msra.mxu0 %v265_v34 }
  0x29   :  { %842 = vmatprep.subr.mxu1 %v267_v30  ;;  %804 = vmatprep.subr.mxu0 %v264_v35 }
  0x2a   :  { %858 = vmatpush3.msra.mxu1 %v267_v30  ;;  %805 = vmatpush3.msra.mxu0 %v264_v35 }
  0x2b   :  { %843 = vmatprep.subr.mxu1 %v266_v33 }
  0x2c   :  { %859 = vmatpush3.msra.mxu1 %v266_v33 }
  0x2d   :  { %844 = vmatprep.subr.mxu1 %v265_v34 }
  0x2e   :  { %860 = vmatpush3.msra.mxu1 %v265_v34 }
  0x2f   :  { %845 = vmatprep.subr.mxu1 %v264_v35 }
  0x30   :  { %861 = vmatpush3.msra.mxu1 %v264_v35 }
  0xca   :  { %v752_v37 = vpop.f32.mrf.mxu0 }
  0xcb   :  { %v175_v38 = vadd.f32 %v752_v37, %v671_v36 }
  0xcc   :  { %v169_v39 = vpop.f32.mrf.mxu0 }
  0xcd   :  { %v170_v40 = vadd.f32 %v671_v36, %v169_v39  ;;  %v249_v43 = vmax.f32 %v175_v38, 0.0 }
  0xce   :  { %v755_v41 = vpop.f32.mrf.mxu0 }
  0xcf   :  { %v248_v42 = vmax.f32 %v170_v40, 0.0  ;;  %v185_v44 = vadd.f32 %v755_v41, %v671_v36 }
  0xd0   :  { %v179_v45 = vpop.f32.mrf.mxu0 }
  0xd1   :  { %v180_v46 = vadd.f32 %v671_v36, %v179_v45  ;;  %806 = vmatprep.mubr.f32.mxu0 %v248_v42  ;;  %v251_v49 = vmax.f32 %v185_v44, 0.0 }
  0xd2   :  { %v758_v47 = vpop.f32.mrf.mxu0  ;;  %807 = vmatmul.mubr.f32.vlgmr.msra.gmra.mxu0 %v249_v43 }
  0xd3   :  { %v250_v48 = vmax.f32 %v180_v46, 0.0  ;;  %v195_v50 = vadd.f32 %v758_v47, %v671_v36 }
  0xd4   :  { %v189_v51 = vpop.f32.mrf.mxu0 }
  0xd5   :  { %v190_v52 = vadd.f32 %v671_v36, %v189_v51  ;;  %809 = vmatprep.mubr.f32.mxu0 %v250_v48  ;;  %v253_v55 = vmax.f32 %v195_v50, 0.0 }
  0xd6   :  { %v761_v53 = vpop.f32.mrf.mxu0  ;;  %810 = vmatmul.mubr.f32.gmra.mxu0 %v251_v49 }
  0xd7   :  { %v252_v54 = vmax.f32 %v190_v52, 0.0  ;;  %v205_v56 = vadd.f32 %v761_v53, %v671_v36 }
  0xd8   :  { %v199_v57 = vpop.f32.mrf.mxu0 }
  0xd9   :  { %812 = vmatprep.mubr.f32.mxu0 %v252_v54  ;;  %v200_v58 = vadd.f32 %v671_v36, %v199_v57  ;;  %v255_v61 = vmax.f32 %v205_v56, 0.0 }
  0xda   :  { %v764_v59 = vpop.f32.mrf.mxu0  ;;  %813 = vmatmul.mubr.f32.gmra.mxu0 %v253_v55 }
  0xdb   :  { %v254_v60 = vmax.f32 %v200_v58, 0.0  ;;  %v215_v62 = vadd.f32 %v764_v59, %v671_v36 }
  0xdc   :  { %v209_v63 = vpop.f32.mrf.mxu0 }
  0xdd   :  { %v210_v0 = vadd.f32 %v671_v36, %v209_v63  ;;  %815 = vmatprep.mubr.f32.mxu1 %v254_v60  ;;  %v257_v3 = vmax.f32 %v215_v62, 0.0 }
  0xde   :  { %v767_v1 = vpop.f32.mrf.mxu0  ;;  %816 = vmatmul.mubr.f32.vlgmr.msra.gmra.mxu1 %v255_v61 }
  0xdf   :  { %v256_v2 = vmax.f32 %v210_v0, 0.0  ;;  %v225_v4 = vadd.f32 %v767_v1, %v671_v36 }
  0xe0   :  { %v219_v5 = vpop.f32.mrf.mxu0 }
  0xe1   :  { %v220_v6 = vadd.f32 %v671_v36, %v219_v5  ;;  %818 = vmatprep.mubr.f32.mxu1 %v256_v2  ;;  %v259_v9 = vmax.f32 %v225_v4, 0.0 }
  0xe2   :  { %v770_v7 = vpop.f32.mrf.mxu0  ;;  %819 = vmatmul.mubr.f32.gmra.mxu1 %v257_v3 }
  0xe3   :  { %v258_v8 = vmax.f32 %v220_v6, 0.0  ;;  %v235_v10 = vadd.f32 %v770_v7, %v671_v36 }
  0xe4   :  { %v229_v11 = vpop.f32.mrf.mxu0 }
  0xe5   :  { %v230_v12 = vadd.f32 %v671_v36, %v229_v11  ;;  %821 = vmatprep.mubr.f32.mxu1 %v258_v8  ;;  %v261_v15 = vmax.f32 %v235_v10, 0.0 }
  0xe6   :  { %v773_v13 = vpop.f32.mrf.mxu0  ;;  %822 = vmatmul.mubr.f32.gmra.mxu1 %v259_v9 }
  0xe7   :  { %v260_v14 = vmax.f32 %v230_v12, 0.0  ;;  %v245_v16 = vadd.f32 %v773_v13, %v671_v36 }
  0xe8   :  { %v239_v17 = vpop.f32.mrf.mxu0 }
  0xe9   :  { %v240_v18 = vadd.f32 %v671_v36, %v239_v17  ;;  %824 = vmatprep.mubr.f32.mxu1 %v260_v14  ;;  %v263_v20 = vmax.f32 %v245_v16, 0.0 }
  0xea   :  { %825 = vmatmul.mubr.f32.gmra.mxu1 %v261_v15 }
  0xeb   :  { %v262_v19 = vmax.f32 %v240_v18, 0.0 }
  0xed   :  { %827 = vmatprep.mubr.f32.mxu1 %v262_v19 }
  0xee   :  { %828 = vmatmul.mubr.f32.gmra.mxu1 %v263_v20 }
 0x192   :  { %v808_v22 = vpop.f32.mrf.mxu0 }
 0x193   :  { %v359_v23 = vadd.f32 %v808_v22, %v1032_v21 }
 0x194   :  { %v353_v24 = vpop.f32.mrf.mxu0 }
 0x195   :  { %v433_v26 = vmax.f32 %v359_v23, 0.0  ;;  %v354_v27 = vadd.f32 %v1032_v21, %v353_v24 }
 0x196   :  { %v811_v28 = vpop.f32.mrf.mxu0 }
 0x197   :  { %v432_v29 = vmax.f32 %v354_v27, 0.0  ;;  %v369_v30 = vadd.f32 %v811_v28, %v1032_v21  ;;  %v456_v31 = vmul.f32 %v1038_v25, %v433_v26 }
 0x198   :  { %v363_v32 = vpop.f32.mrf.mxu0 }
 0x199   :  { %v435_v33 = vmax.f32 %v369_v30, 0.0  ;;  %v364_v34 = vadd.f32 %v1032_v21, %v363_v32  ;;  %v475_v35 = vsel %vm471_vm1, %v456_v31, 0.0  ;;  %v455_v36 = vmul.f32 %v1038_v25, %v432_v29 }
 0x19a   :  { %476 = vadd.xlane.f32.xlu0 %v475_v35  ;;  %v814_v37 = vpop.f32.mrf.mxu0 }
 0x19b   :  { %v434_v38 = vmax.f32 %v364_v34, 0.0  ;;  %v379_v39 = vadd.f32 %v814_v37, %v1032_v21  ;;  %v458_v40 = vmul.f32 %v1038_v25, %v435_v33  ;;  %v472_v42 = vsel %vm471_vm1, %v455_v36, 0.0 }
 0x19c   :  { %v373_v41 = vpop.f32.mrf.mxu0 }
 0x19d   :  { %v437_v43 = vmax.f32 %v379_v39, 0.0  ;;  %v374_v44 = vadd.f32 %v1032_v21, %v373_v41  ;;  %v481_v45 = vsel %vm471_vm1, %v458_v40, 0.0  ;;  %v457_v46 = vmul.f32 %v1038_v25, %v434_v38 }
 0x19e   :  { %v817_v47 = vpop.f32.mrf.mxu1  ;;  %482 = vadd.xlane.f32.xlu1 %v481_v45  ;;  %473 = vadd.xlane.f32.xlu0 %v472_v42  ;;  %v554_v40 = vlaneseq  ;;  %v1095_v45 = vstv %s1153_s6 }
 0x19f   :  { %v436_v48 = vmax.f32 %v374_v44, 0.0  ;;  %v389_v49 = vadd.f32 %v817_v47, %v1032_v21  ;;  %v478_v51 = vsel %vm471_vm1, %v457_v46, 0.0  ;;  %v460_v55 = vmul.f32 %v1038_v25, %v437_v43 }
 0x1a0   :  { %v383_v50 = vpop.f32.mrf.mxu1  ;;  %v1087_v41 = vand.u32 127, %v554_v40  ;;  %v1089_v43 = vshrl.u32 %v554_v40, 7 }
 0x1a1   :  { %v439_v52 = vmax.f32 %v389_v49, 0.0  ;;  %v384_v53 = vadd.f32 %v1032_v21, %v383_v50  ;;  %v459_v54 = vmul.f32 %v1038_v25, %v436_v48  ;;  %v487_v0 = vsel %vm471_vm1, %v460_v55, 0.0 }
 0x1a2   :  { %v820_v56 = vpop.f32.mrf.mxu1  ;;  %479 = vadd.xlane.f32.xlu1 %v478_v51  ;;  %v560_v44 = vadd.s32 4294967288, %v1087_v41  ;;  %v574_v46 = vadd.s32 4294967272, %v1087_v41  ;;  %v558_v48 = vsub.s32 %v1087_v41, %v1089_v43  ;;  %v581_v51 = vadd.s32 4294967264, %v1087_v41 }
 0x1a3   :  { %v438_v57 = vmax.f32 %v384_v53, 0.0  ;;  %v399_v58 = vadd.f32 %v820_v56, %v1032_v21  ;;  %v484_v59 = vsel %vm471_vm1, %v459_v54, 0.0  ;;  %v462_v61 = vmul.f32 %v1038_v25, %v439_v52 }
 0x1a4   :  { %v393_v60 = vpop.f32.mrf.mxu1  ;;  %485 = vadd.xlane.f32.xlu0 %v484_v59  ;;  %v563_v52 = vsub.s32 %v560_v44, %v1089_v43  ;;  %v588_v55 = vadd.s32 4294967256, %v1087_v41  ;;  %v577_v56 = vsub.s32 %v574_v46, %v1089_v43  ;;  %v644_v40 = vadd.s32 4294967192, %v1087_v41 }
 0x1a5   :  { %v441_v62 = vmax.f32 %v399_v58, 0.0  ;;  %v394_v63 = vadd.f32 %v1032_v21, %v393_v60  ;;  %v461_v1 = vmul.f32 %v1038_v25, %v438_v57  ;;  %v493_v7 = vsel %vm471_vm1, %v462_v61, 0.0 }
 0x1a6   :  { %v823_v2 = vpop.f32.mrf.mxu1  ;;  %488 = vadd.xlane.f32.xlu1 %v487_v0  ;;  %v584_v61 = vsub.s32 %v581_v51, %v1089_v43 }
 0x1a7   :  { %v440_v3 = vmax.f32 %v394_v63, 0.0  ;;  %v409_v4 = vadd.f32 %v823_v2, %v1032_v21  ;;  %v490_v5 = vsel %vm471_vm1, %v461_v1, 0.0  ;;  %v464_v11 = vmul.f32 %v1038_v25, %v441_v62 }
 0x1a8   :  { %v403_v6 = vpop.f32.mrf.mxu1  ;;  %491 = vadd.xlane.f32.xlu0 %v490_v5  ;;  %v595_v62 = vadd.s32 4294967248, %v1087_v41 }
 0x1a9   :  { %v443_v8 = vmax.f32 %v409_v4, 0.0  ;;  %v404_v9 = vadd.f32 %v1032_v21, %v403_v6  ;;  %v463_v10 = vmul.f32 %v1038_v25, %v440_v3  ;;  %v499_v20 = vsel %vm471_vm1, %v464_v11, 0.0 }
 0x1aa   :  { %v826_v12 = vpop.f32.mrf.mxu1  ;;  %494 = vadd.xlane.f32.xlu1 %v493_v7  ;;  %v591_v3 = vsub.s32 %v588_v55, %v1089_v43  ;;  %v602_v4 = vadd.s32 4294967240, %v1087_v41 }
 0x1ab   :  { %v442_v13 = vmax.f32 %v404_v9, 0.0  ;;  %v419_v14 = vadd.f32 %v826_v12, %v1032_v21  ;;  %v496_v15 = vsel %vm471_vm1, %v463_v10, 0.0  ;;  %v466_v17 = vmul.f32 %v1038_v25, %v443_v8 }
 0x1ac   :  { %v413_v16 = vpop.f32.mrf.mxu1  ;;  %497 = vadd.xlane.f32.xlu0 %v496_v15  ;;  %v609_v8 = vadd.s32 4294967232, %v1087_v41  ;;  %v598_v12 = vsub.s32 %v595_v62, %v1089_v43  ;;  %v616_v15 = vadd.s32 4294967224, %v1087_v41 }
 0x1ad   :  { %v445_v18 = vmax.f32 %v419_v14, 0.0  ;;  %v414_v19 = vadd.f32 %v1032_v21, %v413_v16  ;;  %v465_v22 = vmul.f32 %v1038_v25, %v442_v13  ;;  %v505_v29 = vsel %vm471_vm1, %v466_v17, 0.0 }
 0x1ae   :  { %v829_v23 = vpop.f32.mrf.mxu1  ;;  %500 = vadd.xlane.f32.xlu1 %v499_v20 }
 0x1af   :  { %v444_v24 = vmax.f32 %v414_v19, 0.0  ;;  %v429_v26 = vadd.f32 %v829_v23, %v1032_v21  ;;  %v502_v27 = vsel %vm471_vm1, %v465_v22, 0.0  ;;  %v468_v33 = vmul.f32 %v1038_v25, %v445_v18 }
 0x1b0   :  { %v423_v28 = vpop.f32.mrf.mxu1  ;;  %503 = vadd.xlane.f32.xlu0 %v502_v27  ;;  %v605_v19 = vsub.s32 %v602_v4, %v1089_v43  ;;  %v612_v22 = vsub.s32 %v609_v8, %v1089_v43  ;;  %v623_v27 = vadd.s32 4294967216, %v1087_v41 }
 0x1b1   :  { %v447_v30 = vmax.f32 %v429_v26, 0.0  ;;  %v424_v31 = vadd.f32 %v1032_v21, %v423_v28  ;;  %v467_v32 = vmul.f32 %v1038_v25, %v444_v24  ;;  %v511_v36 = vsel %vm471_vm1, %v468_v33, 0.0 }
 0x1b2   :  { %506 = vadd.xlane.f32.xlu1 %v505_v29  ;;  %v619_v29 = vsub.s32 %v616_v15, %v1089_v43  ;;  %v630_v33 = vadd.s32 4294967208, %v1087_v41 }
 0x1b3   :  { %v446_v34 = vmax.f32 %v424_v31, 0.0  ;;  %v508_v35 = vsel %vm471_vm1, %v467_v32, 0.0  ;;  %v470_v38 = vmul.f32 %v1038_v25, %v447_v30 }
 0x1b4   :  { %509 = vadd.xlane.f32.xlu0 %v508_v35  ;;  %v637_v35 = vadd.s32 4294967200, %v1087_v41  ;;  %v633_v46 = vsub.s32 %v630_v33, %v1089_v43 }
 0x1b5   :  { %v469_v37 = vmul.f32 %v1038_v25, %v446_v34  ;;  %v517_v21 = vsel %vm471_vm1, %v470_v38, 0.0  ;;  %v567_v25 = vadd.s32 4294967280, %v1087_v41 }
 0x1b6   :  { %512 = vadd.xlane.f32.xlu1 %v511_v36 }
 0x1b7   :  { %v514_v39 = vsel %vm471_vm1, %v469_v37, 0.0  ;;  %v570_v54 = vsub.s32 %v567_v25, %v1089_v43 }
 0x1b8   :  { %515 = vadd.xlane.f32.xlu0 %v514_v39  ;;  %v626_v39 = vsub.s32 %v623_v27, %v1089_v43 }
 0x1ba   :  { %518 = vadd.xlane.f32.xlu1 %v517_v21 }
 0x223   :  { %v477_v42 = vpop.xlane.xlu0 %476 }
 0x224   :  { %v523_v53 = vadd.f32 %v1095_v45, %v477_v42 }
 0x226   :  { %v564_v63 = vrot.slane %v523_v53, %v563_v52  ;;  %v651_v52 = vadd.s32 4294967184, %v1087_v41 }
 0x227   :  { %v483_v47 = vpop.xlane.xlu1 %482  ;;  %v474_v49 = vpop.xlane.xlu0 %473 }
 0x228   :  { %v522_v50 = vadd.f32 %v1095_v45, %v474_v49  ;;  %v525_v57 = vadd.f32 %v1095_v45, %v483_v47 }
 0x22a   :  { %v559_v58 = vrot.slane %v522_v50, %v558_v48  ;;  %v578_v5 = vrot.slane %v525_v57, %v577_v56  ;;  %v640_v48 = vsub.s32 %v637_v35, %v1089_v43 }
 0x22b   :  { %v480_v59 = vpop.xlane.xlu1 %479 }
 0x22c   :  { %v524_v60 = vadd.f32 %v1095_v45, %v480_v59  ;;  %v566_v6 = vsel %vm565_vm2, %v564_v63, %v559_v58  ;;  %v658_v58 = vadd.s32 4294967176, %v1087_v41  ;;  %v654_v63 = vsub.s32 %v651_v52, %v1089_v43 }
 0x22d   :  { %v486_v0 = vpop.xlane.xlu0 %485 }
 0x22e   :  { %v571_v1 = vrot.slane %v524_v60, %v570_v54  ;;  %v526_v2 = vadd.f32 %v1095_v45, %v486_v0  ;;  %v647_v54 = vsub.s32 %v644_v40, %v1089_v43  ;;  %v661_v4 = vsub.s32 %v658_v58, %v1089_v43 }
 0x22f   :  { %v489_v7 = vpop.xlane.xlu1 %488 }
 0x230   :  { %v573_v9 = vsel %vm572_vm3, %v571_v1, %v566_v6  ;;  %v585_v10 = vrot.slane %v526_v2, %v584_v61  ;;  %v527_v11 = vadd.f32 %v1095_v45, %v489_v7 }
 0x231   :  { %v580_v13 = vsel %vm579_vm4, %v578_v5, %v573_v9  ;;  %v492_v14 = vpop.xlane.xlu0 %491 }
 0x232   :  { %v587_v16 = vsel %vm586_vm5, %v585_v10, %v580_v13  ;;  %v592_v17 = vrot.slane %v527_v11, %v591_v3  ;;  %v528_v18 = vadd.f32 %v1095_v45, %v492_v14 }
 0x233   :  { %v495_v20 = vpop.xlane.xlu1 %494 }
 0x234   :  { %v594_v23 = vsel %vm593_vm6, %v592_v17, %v587_v16  ;;  %v599_v24 = vrot.slane %v528_v18, %v598_v12  ;;  %v529_v26 = vadd.f32 %v1095_v45, %v495_v20 }
 0x235   :  { %v498_v28 = vpop.xlane.xlu0 %497 }
 0x236   :  { %v601_v30 = vsel %vm600_vm7, %v599_v24, %v594_v23  ;;  %v606_v31 = vrot.slane %v529_v26, %v605_v19  ;;  %v530_v32 = vadd.f32 %v1095_v45, %v498_v28 }
 0x237   :  { %v501_v34 = vpop.xlane.xlu1 %500 }
 0x238   :  { %v608_v36 = vsel %vm607_vm8, %v606_v31, %v601_v30  ;;  %v613_v37 = vrot.slane %v530_v32, %v612_v22  ;;  %v531_v38 = vadd.f32 %v1095_v45, %v501_v34 }
 0x239   :  { %v504_v21 = vpop.xlane.xlu0 %503 }
 0x23a   :  { %v615_v42 = vsel %vm614_vm9, %v613_v37, %v608_v36  ;;  %v620_v44 = vrot.slane %v531_v38, %v619_v29  ;;  %v532_v25 = vadd.f32 %v1095_v45, %v504_v21 }
 0x23b   :  { %v507_v47 = vpop.xlane.xlu1 %506 }
 0x23c   :  { %v622_v49 = vsel %vm621_vm10, %v620_v44, %v615_v42  ;;  %v627_v50 = vrot.slane %v532_v25, %v626_v39  ;;  %v533_v51 = vadd.f32 %v1095_v45, %v507_v47 }
 0x23d   :  { %v510_v53 = vpop.xlane.xlu0 %509 }
 0x23e   :  { %v629_v55 = vsel %vm628_vm11, %v627_v50, %v622_v49  ;;  %v634_v56 = vrot.slane %v533_v51, %v633_v46  ;;  %v534_v57 = vadd.f32 %v1095_v45, %v510_v53 }
 0x23f   :  { %v513_v59 = vpop.xlane.xlu1 %512 }
 0x240   :  { %v636_v60 = vsel %vm635_vm12, %v634_v56, %v629_v55  ;;  %v641_v61 = vrot.slane %v534_v57, %v640_v48  ;;  %v535_v62 = vadd.f32 %v1095_v45, %v513_v59 }
 0x241   :  { %v516_v0 = vpop.xlane.xlu0 %515 }
 0x242   :  { %v643_v1 = vsel %vm642_vm13, %v641_v61, %v636_v60  ;;  %v648_v2 = vrot.slane %v535_v62, %v647_v54  ;;  %v536_v3 = vadd.f32 %v1095_v45, %v516_v0 }
 0x243   :  { %v519_v5 = vpop.xlane.xlu1 %518 }
 0x244   :  { %v650_v6 = vsel %vm649_vm14, %v648_v2, %v643_v1  ;;  %v655_v41 = vrot.slane %v536_v3, %v654_v63  ;;  %v537_v7 = vadd.f32 %v1095_v45, %v519_v5 }
 0x246   :  { %v657_v8 = vsel %vm656_vm15, %v655_v41, %v650_v6  ;;  %v662_v9 = vrot.slane %v537_v7, %v661_v4 }
 0x248   :  { %v664_v10 = vsel %vm663_vm0, %v662_v9, %v657_v8 }
 0x249   :  { %666 = vst [vmem:[%s1154_s7] sm:$0x1] %v664_v10 }

</bundles_post_ra>
